<compile_context>
chip_gen: v7x
topology: tpu7x:2x2x1
jax: 0.10.0
libtpu: 0.0.40
codegen_flags: <defaults>
</compile_context>

<pallas_src>
import functools

import jax
import jax.numpy as jnp
from jax.experimental import pallas as pl
from jax.experimental.pallas import tpu as pltpu

_MIB = 1024 * 1024


def _gemma_rmsnorm_kernel(x_ref, w_ref, b_ref, o_ref, *, eps: float):
    # x_ref: (block_rows, H), w_ref/b_ref: (1, H), o_ref: (block_rows, H)
    # Pass 1: fp32 sum-of-squares, streamed from the input tile.
    x32 = x_ref[...].astype(jnp.float32)
    variance = jnp.mean(x32 * x32, axis=-1, keepdims=True)
    # rsqrt lowers to the EUP slot; the lane reduce goes to the XLU slot --
    # both effectively free next to the vld/vst + HBM traffic.
    inv = jax.lax.rsqrt(variance + eps)
    # Pass 2: re-read the input tile (avoids holding a full-tile fp32 copy
    # live across the reduce), normalize, cast back to og dtype, then the
    # Gemma-style affine in fp32 (matches PyTorch promotion).
    xn = (x_ref[...].astype(jnp.float32) * inv).astype(x_ref.dtype)
    out = xn.astype(jnp.float32) * (1.0 + w_ref[...].astype(jnp.float32)) \
        + b_ref[...].astype(jnp.float32)
    o_ref[...] = out.astype(o_ref.dtype)


def _vmem_capacity_bytes() -> int:
    """Physical VMEM per TensorCore; conservative fallback if query fails."""
    try:
        return int(pltpu.get_tpu_info().vmem_capacity_bytes)
    except Exception:
        return 64 * _MIB  # v7x per-TC capacity; safe lower bound everywhere.


def _round_up(x: int, m: int) -> int:
    return (x + m - 1) // m * m


def _round_down(x: int, m: int) -> int:
    return (x // m) * m


def gemma_rms_layer_norm(x, weight, bias, *, eps: float = 1e-5, block_rows=None):
    """x: (..., H); weight, bias: (H,). Output dtype follows PyTorch promotion.

    NOTE: eps defaults to the nn.Module default (1e-5); Gemma configs typically
    set rms_norm_eps=1e-6 -- callers must pass the module's eps.
    """
    orig_shape = x.shape
    H = orig_shape[-1]
    x2d = x.reshape(-1, H)
    R = x2d.shape[0]

    # Output dtype: xn is cast back to x.dtype, then the affine promotes with
    # the parameter dtype (e.g. bf16 x with fp32 params -> fp32 output).
    out_dtype = jnp.result_type(x.dtype, weight.dtype, bias.dtype)
    in_bytes = jnp.dtype(x.dtype).itemsize
    out_bytes = jnp.dtype(out_dtype).itemsize

    # Sublane alignment for the row axis: 8 for 32-bit, 16 for 16-bit, 32 for 8-bit.
    min_itemsize = max(1, min(in_bytes, out_bytes))
    align = max(8, 32 // min_itemsize)

    # Generation-aware VMEM budgeting: scoped limit ~ 3/4 of physical VMEM
    # capped at 96 MiB (=> ~48 MiB on v7x, 96 MiB on v5e/v6e).
    vmem_cap = _vmem_capacity_bytes()
    vmem_limit = int(min(vmem_cap * 3 // 4, 96 * _MIB))

    # Honest per-row VMEM footprint:
    #   double-buffered input + output tiles:  2*H*(in_bytes + out_bytes)
    #   in-kernel temporaries (fp32 square/normalize temp, xn in og dtype,
    #   fp32 affine temp -- conservatively ~8B + in_bytes per element):
    io_bytes_per_row = 2 * H * (in_bytes + out_bytes)
    tmp_bytes_per_row = H * (8 + in_bytes)
    bytes_per_row = io_bytes_per_row + tmp_bytes_per_row

    # Leave ~30% headroom inside the scoped limit for the compiler.
    tile_budget = vmem_limit * 7 // 10

    # Guard for very wide H: even an `align`-row block overshoots the budget.
    if align * bytes_per_row > tile_budget:
        vmem_limit = int(min(vmem_cap * 7 // 8, 120 * _MIB))
        tile_budget = vmem_limit * 7 // 10
        # TODO(synk): for extremely wide H that still doesn't fit, fall back to
        # an H-tiled two-pass variant (2-D grid, "arbitrary" H axis accumulating
        # sum-of-squares) instead of relying on compiler retiling.

    if block_rows is None:
        # Rows allowed by the VMEM budget.
        rows_budget = max(align, _round_down(tile_budget // bytes_per_row, align))
        # Byte-based cap on the input tile (~8 MiB of input per grid step keeps
        # each DMA several microseconds long on every generation, and lets
        # block_rows grow far past 1024 for small H).
        rows_cap = max(align, _round_down((8 * _MIB) // max(1, H * in_bytes), align))
        block_rows = min(rows_budget, rows_cap)

    if R <= align:
        # Full-extent block along rows is always layout-legal.
        block_rows = R
    else:
        block_rows = _round_up(block_rows, align)
        # Guarantee >= 2 grid steps so the ("parallel",) row axis actually
        # shards across both TensorCores on v7x (harmless on v5e/v6e).
        block_rows = min(block_rows, _round_up(pl.cdiv(R, 2), align))
        block_rows = max(block_rows, align)

    grid_rows = pl.cdiv(R, block_rows)

    w2d = weight.reshape(1, H)
    b2d = bias.reshape(1, H)

    kernel = functools.partial(_gemma_rmsnorm_kernel, eps=eps)

    out = pl.pallas_call(
        kernel,
        out_shape=jax.ShapeDtypeStruct((R, H), out_dtype),
        grid_spec=pl.GridSpec(
            grid=(grid_rows,),
            in_specs=[
                pl.BlockSpec((block_rows, H), lambda i: (i, 0)),
                pl.BlockSpec((1, H), lambda i: (0, 0)),
                pl.BlockSpec((1, H), lambda i: (0, 0)),
            ],
            out_specs=pl.BlockSpec((block_rows, H), lambda i: (i, 0)),
        ),
        compiler_params=pltpu.CompilerParams(
            dimension_semantics=("parallel",),   # shards the row loop across TCs on v7x
            vmem_limit_bytes=vmem_limit,
        ),
    )(x2d, w2d, b2d)

    return out.reshape(orig_shape[:-1] + (H,))


def _reference(x, weight, bias, eps):
    x32 = x.astype(jnp.float32)
    variance = jnp.mean(x32 * x32, axis=-1, keepdims=True)
    xn = (x32 * jax.lax.rsqrt(variance + eps)).astype(x.dtype)
    out = xn.astype(jnp.float32) * (1.0 + weight.astype(jnp.float32)) \
        + bias.astype(jnp.float32)
    return out.astype(jnp.result_type(x.dtype, weight.dtype, bias.dtype))


if __name__ == "__main__":
    key = jax.random.PRNGKey(0)
    kx, kw, kb = jax.random.split(key, 3)

    batch, seq, hidden = 2, 8, 128
    eps = 1e-5  # module default; Gemma configs typically set rms_norm_eps=1e-6

    # fp32 parameters (module __init__ gives ones/zeros; use non-trivial values
    # so the (1 + weight) path is exercised).
    weight = 0.1 * jax.random.normal(kw, (hidden,), dtype=jnp.float32)
    bias = 0.1 * jax.random.normal(kb, (hidden,), dtype=jnp.float32)

    # --- fp32 activations ---
    x_f32 = jax.random.normal(kx, (batch, seq, hidden), dtype=jnp.float32)
    out_f32 = jax.block_until_ready(gemma_rms_layer_norm(x_f32, weight, bias, eps=eps))
    ref_f32 = _reference(x_f32, weight, bias, eps)
    assert out_f32.shape == x_f32.shape
    assert out_f32.dtype == ref_f32.dtype
    assert jnp.allclose(out_f32, ref_f32, atol=1e-5, rtol=1e-5), "fp32 mismatch vs reference"

    # --- bf16 activations (mem-bound path: half the input bytes moved) ---
    x_bf16 = x_f32.astype(jnp.bfloat16)
    out_bf16 = jax.block_until_ready(gemma_rms_layer_norm(x_bf16, weight, bias, eps=eps))
    ref_bf16 = _reference(x_bf16, weight, bias, eps)
    assert out_bf16.shape == x_bf16.shape
    assert out_bf16.dtype == ref_bf16.dtype  # promoted to fp32, matching PyTorch
    assert jnp.allclose(out_bf16, ref_bf16, atol=5e-2, rtol=5e-2), "bf16 mismatch vs reference"

    # --- ragged row count (exercises the cdiv grid + partial boundary block;
    #     no jnp.pad / slice copies anymore) ---
    x_odd = jax.random.normal(kx, (3, 7, hidden), dtype=jnp.float32)
    out_odd = jax.block_until_ready(gemma_rms_layer_norm(x_odd, weight, bias, eps=eps))
    ref_odd = _reference(x_odd, weight, bias, eps)
    assert jnp.allclose(out_odd, ref_odd, atol=1e-5, rtol=1e-5), "ragged mismatch vs reference"

    # --- larger row count (forces >=2 grid steps path) ---
    x_big = jax.random.normal(kx, (4, 64, hidden), dtype=jnp.bfloat16)
    out_big = jax.block_until_ready(gemma_rms_layer_norm(x_big, weight, bias, eps=eps))
    ref_big = _reference(x_big, weight, bias, eps)
    assert jnp.allclose(out_big, ref_big, atol=5e-2, rtol=5e-2), "big mismatch vs reference"

    print("KERNEL_OK")
</pallas_src>

<mosaic_0001>
module attributes {stable_mosaic.version = 11 : i64} {
  func.func @_gemma_rmsnorm_kernel(%arg0: i32, %arg1: memref<8x128xf32, #tpu.memory_space<vmem>>, %arg2: memref<1x128xf32, #tpu.memory_space<vmem>>, %arg3: memref<1x128xf32, #tpu.memory_space<vmem>>, %arg4: memref<8x128xf32, #tpu.memory_space<vmem>>) attributes {dimension_semantics = [#tpu.dimension_semantics<parallel>], iteration_bounds = array<i64: 2>, scalar_prefetch = 0 : i64, scratch_operands = 0 : i64, tpu.core_type = #tpu.core_type<tc>, window_params = [{transform_indices = @transform_0, window_bounds = array<i64: 8, 128>}, {pipeline_mode = #tpu.pipeline_mode<synchronous>, transform_indices = @transform_1, window_bounds = array<i64: 1, 128>}, {pipeline_mode = #tpu.pipeline_mode<synchronous>, transform_indices = @transform_2, window_bounds = array<i64: 1, 128>}, {transform_indices = @transform_3, window_bounds = array<i64: 8, 128>}]} {
    %c0 = arith.constant 0 : index
    %c0_0 = arith.constant 0 : index
    %0 = vector.load %arg1[%c0, %c0_0] : memref<8x128xf32, #tpu.memory_space<vmem>>, vector<8x128xf32>
    %1 = arith.mulf %0, %0 : vector<8x128xf32>
    %cst = arith.constant dense<0.000000e+00> : vector<8xf32>
    %2 = vector.multi_reduction <add>, %1, %cst [1] : vector<8x128xf32> to vector<8xf32>
    %3 = vector.shape_cast %2 : vector<8xf32> to vector<8x1xf32>
    %cst_1 = arith.constant 1.280000e+02 : f32
    %4 = vector.broadcast %cst_1 : f32 to vector<8x1xf32>
    %5 = arith.divf %3, %4 : vector<8x1xf32>
    %cst_2 = arith.constant 9.99999974E-6 : f32
    %6 = vector.broadcast %cst_2 : f32 to vector<8x1xf32>
    %7 = arith.addf %5, %6 : vector<8x1xf32>
    %8 = math.rsqrt %7 : vector<8x1xf32>
    %c0_3 = arith.constant 0 : index
    %c0_4 = arith.constant 0 : index
    %9 = vector.load %arg1[%c0_3, %c0_4] : memref<8x128xf32, #tpu.memory_space<vmem>>, vector<8x128xf32>
    %10 = vector.broadcast %8 : vector<8x1xf32> to vector<8x128xf32>
    %11 = arith.mulf %9, %10 : vector<8x128xf32>
    %c0_5 = arith.constant 0 : index
    %c0_6 = arith.constant 0 : index
    %12 = vector.load %arg2[%c0_5, %c0_6] : memref<1x128xf32, #tpu.memory_space<vmem>>, vector<1x128xf32>
    %cst_7 = arith.constant 1.000000e+00 : f32
    %13 = vector.broadcast %cst_7 : f32 to vector<1x128xf32>
    %14 = arith.addf %13, %12 : vector<1x128xf32>
    %15 = vector.broadcast %14 : vector<1x128xf32> to vector<8x128xf32>
    %16 = arith.mulf %11, %15 : vector<8x128xf32>
    %c0_8 = arith.constant 0 : index
    %c0_9 = arith.constant 0 : index
    %17 = vector.load %arg3[%c0_8, %c0_9] : memref<1x128xf32, #tpu.memory_space<vmem>>, vector<1x128xf32>
    %18 = vector.broadcast %17 : vector<1x128xf32> to vector<8x128xf32>
    %19 = arith.addf %16, %18 : vector<8x128xf32>
    %c0_10 = arith.constant 0 : index
    %c0_11 = arith.constant 0 : index
    %20 = vector.load %arg4[%c0_10, %c0_11] : memref<8x128xf32, #tpu.memory_space<vmem>>, vector<8x128xf32>
    tpu.vector_store %arg4[%c0_10, %c0_11], %19 {strides = array<i32>} : memref<8x128xf32, #tpu.memory_space<vmem>>, vector<8x128xf32>,
    return
  }
  func.func @transform_0(%arg0: i32) -> (i32, i32) {
    %c0_i32 = arith.constant 0 : i32
    %c0_i32_0 = arith.constant 0 : i32
    return %arg0, %c0_i32 : i32, i32
  }
  func.func @transform_1(%arg0: i32) -> (i32, i32) {
    %c0_i32 = arith.constant 0 : i32
    %c0_i32_0 = arith.constant 0 : i32
    %c0_i32_1 = arith.constant 0 : i32
    return %c0_i32, %c0_i32_0 : i32, i32
  }
  func.func @transform_2(%arg0: i32) -> (i32, i32) {
    %c0_i32 = arith.constant 0 : i32
    %c0_i32_0 = arith.constant 0 : i32
    %c0_i32_1 = arith.constant 0 : i32
    return %c0_i32, %c0_i32_0 : i32, i32
  }
  func.func @transform_3(%arg0: i32) -> (i32, i32) {
    %c0_i32 = arith.constant 0 : i32
    %c0_i32_0 = arith.constant 0 : i32
    return %arg0, %c0_i32 : i32, i32
  }
}

</mosaic_0001>

<bundles_post_ra>
// kernel: tpu_custom_call.1
= control target key start
LH: loop header
LB: loop body
LE: loop exit
PB: predicated region body
PF: predicated region fallthrough
CT: control target
= control target key end

     0   :  { %8 = vsyncpa [#allocation3], 0  ;;  %s645_s0 = inlined_call_operand.hbm [shape: f32[16,128], index: 0, kind: input, shape index: {}]   ;;  %s646_s1 = inlined_call_operand.vmem [shape: f32[1,128], index: 1, kind: input, shape index: {}]   ;;  %s647_s2 = inlined_call_operand.vmem [shape: f32[1,128], index: 2, kind: input, shape index: {}]   ;;  %s648_s3 = inlined_call_operand.hbm [shape: f32[16,128], index: 3, kind: output, shape index: {}]  }
   0x1   :  { %10 = vsyncpa [#allocation3 + $0x1], 0 }
   0x2   :  { %11 = vsyncpa [#allocation4], 0 }
   0x3   :  { %13 = vsyncpa [#allocation4 + $0x1], 0  ;;  %s478_s12 = smov 0   ;;  %s480_s13 = smov 0  }
   0x4   :  { %s482_s14 = smov 0   ;;  %s484_s15 = smov 0  }
   0x5 LB: > { %s499_s16 = sadd.s32 4294967295, %s454_s15   ;;  %s297_s17 = sadd.s32 4294967294, %s454_s15   ;;  %s454_s15 = sphi %s484_s15, %s663_s15   ;;  %s450_s14 = sphi %s482_s14, %s662_s14   ;;  %s446_s13 = sphi %s480_s13, %s661_s13   ;;  %s442_s12 = sphi %s478_s12, %s660_s12  }
   0x6   : > { %s503_s18 = sadd.s32 1, %s454_s15   ;;  %s26_s19 = sadd.s32 1, %s450_s14 }
   0x7   : > { %s23_s20 = ssub.s32 %s454_s15, %s503_s18  ;;  %p33_p0 = scmp.ne.s32.totalorder %s450_s14, %s446_s13 }
   0x8   : > { %p24_p1 = scmp.eq.s32.totalorder %s23_s20, 0  ;;  %p34_p2 = scmp.eq.s32.totalorder %s454_s15, 0 }
   0x9   : > { %p39_p3 = scmp.ne.s32.totalorder %s446_s13, %s442_s12  ;;  %p40_p4 = scmp.eq.s32.totalorder %s499_s16, 0 }
   0xa   : > { %s515_s21 = scalar_select %p24_p1, %s450_s14, %s26_s19  }
   0xb   : > { %p517_p5 = por %p34_p2, %p33_p0  ;;  %p521_p6 = por %p40_p4, %p39_p3 }
   0xc   : > { %p105_p7 = scmp.eq.s32.totalorder %s499_s16, 1  ;;  %p111_p8 = scmp.eq.s32.totalorder %s297_s17, 1 }
   0xd   : > { %p322_p10 = scmp.lt.s32.totalorder %s454_s15, 2  ;;  %s137_s26 = sand.u32 1, %s450_s14  }
   0xe   : > { %p528_p11 = por %p105_p7, %p33_p0  ;;  %p532_p12 = por %p111_p8, %p39_p3 }
   0xf   : > { %s301_s27 = sshll.u32 %s454_s15, 7  ;;  %s300_s28 = sshll.u32 %s137_s26, 3 }
  0x10   : > { %s652_s24 = scalar_select %p528_p11, 1, 0 }
  0x11   : > { %s653_s25 = scalar_select %p532_p12, 1, 0 }
  0x12   : > { %s541_s4 = scalar_lea.hbm %s645_s0, %s301_s27  ;;  %s141_s5 = scalar_lea.vmem [#allocation2], %s300_s28 }
  0x13   : > { %s148_s6 = sshll.u32 %s141_s5, 4  ;;  %p545_p13 = pnand %p322_p10, %p517_p5  ;;  %s549_s6 = int_to_ptr.vmem [resolvable:$true] %s148_s6 }
  0x14   : > { %s138_s8 = scalar_lea.sflag [#allocation3], %s137_s26  ;;  %s358_s9 = scalar_lea.hbm %s541_s4, 128 }
  0x15   : > { %p359_p2 = scmp.ne.s32.totalorder %s541_s4, %s358_s9  ;;  %p360_p3 = pneg %p545_p13 }
  0x16   : > { %s363_s17 = scalar_lea.hbm %s645_s0, 256  ;;  %p364_p5 = scmp.lt.u32.totalorder %s541_s4, %s645_s0 }
  0x17   : > { %p361_p4 = pnand %p360_p3, %p359_p2  ;;  %p365_p8 = scmp.lt.u32.totalorder %s363_s17, %s358_s9 }
  0x18   : > { %p367_p9 = scmp.lt.u32.totalorder %s358_s9, %s541_s4 }
  0x19   : > { %p362_p7 = pneg %p361_p4  ;;  %p366_p10 = por %p365_p8, %p364_p5 }
  0x1b   : > { %p368_p0 = por %p367_p9, %p366_p10 }
  0x1d   : > { %p369_p1 = pnand %p368_p0, %p362_p7 }
  0x1f   : > { %372 = shalt.err (!%p369_p1)
}
  0x20   : > { %s373_s22 = scalar_lea.vmem %s549_s6, 128  ;;  %s456_s26 = smov [#allocation2]  }
  0x21   : > { %p374_p2 = scmp.ne.s32.totalorder %s549_s6, %s373_s22  ;;  %s378_s27 = sshll.u32 %s456_s26, 4  ;;  %s379_s27 = int_to_ptr.vmem [resolvable:$false] %s378_s27 }
  0x22   : > { %s380_s28 = scalar_lea.vmem %s379_s27, 256  ;;  %p381_p11 = scmp.lt.s32.totalorder %s549_s6, %s379_s27 }
  0x23   : > { %p376_p4 = pnand %p374_p2, %p360_p3  ;;  %p382_p5 = scmp.lt.s32.totalorder %s380_s28, %s373_s22 }
  0x25   : > { %p377_p12 = pneg %p376_p4  ;;  %p383_p8 = por %p382_p5, %p381_p11 }
  0x27   : > { %p384_p9 = pnand %p383_p8, %p377_p12 }
  0x29   : > { %387 = shalt.err (!%p384_p9)
}
  0x2a   : > { %317 = dma.hbm_to_vmem [thread:$0]  (!%p545_p13), %s541_s4, 128, %s549_s6, %s138_s8  }
  0x2b   : > { %p655_p0 = scmp.lt.s32.totalorder %s454_s15, 3  ;;  %p656_p1 = scmp.ge.s32.totalorder %s454_s15, 1 }
  0x2d   : > { %p154_p3 = pnand %p656_p1, %p655_p0 }
  0x2e   : > { %s583_s29 = sand.u32 (!%p154_p3), 1, %s446_s13  }
  0x2f   : > { %157 = sbr.rel (%p154_p3) target bundleno = 235 (0xeb), region = 32  ;;  %s303_s30 = sshll.u32 (!%p154_p3), %s583_s29, 3 }
  0x30   : > { %s160_s5 = scalar_lea.sflag (!%p154_p3), [#allocation3], %s583_s29  ;;  %s163_s9 = scalar_lea.vmem (!%p154_p3), [#allocation2], %s303_s30 }
  0x36   : > { %433 = dma.done.wait (%p521_p6), %s160_s5, 128  }
  0x37   : > { %435 = vsyncadd (%p521_p6), %s160_s5, 4294967168  ;;  %v186_v0 = vld [vmem:[%s163_s9] sm:$0xff]  ;;  %v198_v4 = vlaneseq  ;;  %s307_s8 = sshll.u32 %s499_s16, 7  ;;  %s185_s10 = scalar_lea.vmem [#allocation5], %s303_s30 }
  0x38   : > { %v187_v1 = vmul.f32 %v186_v0, %v186_v0  ;;  %v195_v7 = vld [vmem:[%s646_s1] sm:$0x1]  ;;  %s227_s11 = sshll.u32 %s185_s10, 4  ;;  %s601_s20 = scalar_lea.hbm %s648_s3, %s307_s8  ;;  %s603_s11 = int_to_ptr.vmem [resolvable:$true] %s227_s11 }
  0x39   : > { %v199_v6 = vshrl.u32 %v198_v4, 7  ;;  %v196_v8 = vadd.f32 1.0, %v195_v7  ;;  %v305_v13 = vld [vmem:[%s647_s2] ss:$0 sm:$0xff]  ;;  %s214_s22 = scalar_lea.sflag [#allocation4], %s583_s29  ;;  %s388_s26 = scalar_lea.vmem %s603_s11, 128 }
  0x3a   : > { %188 = vadd.xlane.f32.xlu0 %v187_v1  ;;  %p389_p6 = scmp.ne.s32.totalorder %s603_s11, %s388_s26  ;;  %p657_p11 = scmp.ne.s32.totalorder %s652_s24, 0 }
  0x3b   : > { %v200_v9 = vsub.s32 0, %v199_v6  ;;  %s457_s16 = smov [#allocation5]  }
  0x3c   : > { %p390_p12 = pnand %p389_p6, %p657_p11  ;;  %s392_s27 = sshll.u32 %s457_s16, 4  ;;  %s393_s27 = int_to_ptr.vmem [resolvable:$false] %s392_s27 }
  0x3d   : > { %v201_v10 = vrot.slane %v196_v8, %v200_v9  ;;  %s394_s28 = scalar_lea.vmem %s393_s27, 256  ;;  %p395_p7 = scmp.lt.s32.totalorder %s603_s11, %s393_s27 }
  0x3e   : > { %p391_p13 = pneg %p390_p12  ;;  %p396_p10 = scmp.lt.s32.totalorder %s394_s28, %s388_s26 }
  0x40   : > { %p397_p2 = por %p396_p10, %p395_p7 }
  0x42   : > { %p398_p4 = pnand %p397_p2, %p391_p13 }
  0xc7   : > { %v189_v2 = vpop.xlane.xlu0 %188 }
  0xc8   : > { %v191_v3 = vmul.f32 0.0078125, %v189_v2 }
  0xca   : > { %v192_v5 = vadd.f32 1e-05, %v191_v3 }
  0xcc   : > { %356 = vrsqrt.f32 %v192_v5 }
  0xd6   : > { %v357_v11 = vpop.eup %356 }
  0xd7   : > { %v194_v12 = vmul.f32 %v357_v11, %v186_v0 }
  0xd9   : > { %v203_v14 = vmul.f32 %v201_v10, %v194_v12 }
  0xdb   : > { %v211_v15 = vadd.f32 %v305_v13, %v203_v14 }
  0xdd   : > { %212 = vst [vmem:[%s185_s10] sm:$0xff] %v211_v15 }
  0xde   : > { %401 = shalt.err (!%p398_p4)
}
  0xdf   : > { %s402_s29 = scalar_lea.hbm %s601_s20, 128  ;;  %s406_s9 = scalar_lea.hbm %s648_s3, 256 }
  0xe0   : > { %p403_p5 = scmp.ne.s32.totalorder %s601_s20, %s402_s29  ;;  %p407_p0 = scmp.lt.u32.totalorder %s601_s20, %s648_s3 }
  0xe1   : > { %p408_p1 = scmp.lt.u32.totalorder %s406_s9, %s402_s29  ;;  %p410_p6 = scmp.lt.u32.totalorder %s402_s29, %s601_s20 }
  0xe2   : > { %p404_p8 = pnand %p403_p5, %p657_p11 }
  0xe3   : > { %p409_p3 = por %p408_p1, %p407_p0 }
  0xe4   : > { %p405_p9 = pneg %p404_p8 }
  0xe5   : > { %p411_p12 = por %p410_p6, %p409_p3 }
  0xe7   : > { %p412_p13 = pnand %p411_p12, %p405_p9 }
  0xe9   : > { %415 = shalt.err (!%p412_p13)
}
  0xea   : > { %312 = dma.vmem_to_hbm [thread:$0]  (%p657_p11), %s603_s11, 128, %s601_s20, %s214_s22  }
  0xeb PF: > { %s239_s23 = sand.u32 1, %s442_s12   ;;  %p658_p7 = scmp.ne.s32.totalorder %s653_s25, 0 }
  0xec   : > { %p659_p10 = scmp.ge.s32.totalorder %s454_s15, 2  ;;  %s240_s7 = scalar_lea.sflag [#allocation4], %s239_s23 }
  0xee   : > { %p319_p2 = pnand %p659_p10, %p658_p7 }
  0xf0   : > { %437 = dma.done.wait (!%p319_p2), %s240_s7, 128  }
  0xf1   : > { %439 = vsyncadd (!%p319_p2), %s240_s7, 4294967168  ;;  %p16_p4 = scmp.ge.s32.totalorder %s503_s18, 4   ;;  %s660_s12 = smov %s446_s13 }
  0xf2   : > { %s661_s13 = smov %s450_s14  ;;  %s662_s14 = smov %s515_s21 }
  0xf3   : > { %s663_s15 = smov %s503_s18  ;;  %18 = sbr.rel (!%p16_p4) target bundleno = 5 (0x5), region = 77 }
  0xfa   :  { %245 = vsyncpa [#allocation3], 1 }
  0xfb   :  { %247 = vsyncpa [#allocation3 + $0x1], 1 }
  0xfc   :  { %248 = vsyncpa [#allocation4], 1 }
  0xfd   :  { %250 = vsyncpa [#allocation4 + $0x1], 1 }

</bundles_post_ra>
